<compile_context>
chip_gen: v6e
topology: v6e:2x2x1
jax: 0.10.0
libtpu: 0.0.40
codegen_flags: <defaults>
</compile_context>

<pallas_src>
import numpy as np
import jax
import jax.numpy as jnp
from jax import lax
from jax.experimental import pallas as pl
from jax.experimental.pallas import tpu as pltpu

HIDDEN = 32
BLOCK_SIZE = 4
REDUCTION_RATIO = 0.5
SPARSE_THRESHOLD = 0.7


def _round_up(n, m):
    return ((n + m - 1) // m) * m


# ----------------------------------------------------------------------------
# GELU (exact, erf-based) via the A&S 7.1.26 polynomial — guaranteed Mosaic
# lowering (exp/abs/where only), ~1e-7 abs error vs exact erf.
# ----------------------------------------------------------------------------
_A1, _A2, _A3, _A4, _A5 = 0.254829592, -0.284496736, 1.421413741, -1.453152027, 1.061405429
_P = 0.3275911
_INV_SQRT2 = 0.7071067811865476


def _gelu_exact(x):
    xs = x * _INV_SQRT2
    ax = jnp.abs(xs)
    t = 1.0 / (1.0 + _P * ax)
    poly = ((((_A5 * t + _A4) * t + _A3) * t + _A2) * t + _A1) * t
    erf = 1.0 - poly * jnp.exp(-ax * ax)
    erf = jnp.where(xs >= 0.0, erf, -erf)
    return 0.5 * x * (1.0 + erf)


def _gelu_np(x):
    xs = x * _INV_SQRT2
    ax = np.abs(xs)
    t = 1.0 / (1.0 + _P * ax)
    poly = ((((_A5 * t + _A4) * t + _A3) * t + _A2) * t + _A1) * t
    erf = 1.0 - poly * np.exp(-ax * ax)
    erf = np.where(xs >= 0.0, erf, -erf)
    return (0.5 * x * (1.0 + erf)).astype(np.float32)


# ----------------------------------------------------------------------------
# Host-side parameter packing (done once per forward; all tiny)
#   wstack [64, H] : rows 0:H/2 = rc_w1, H/2:H/2+H/4 = is_w1, next H = post_w@pre_w
#   bstack [64, 1] : matching bias column (b_comb = post_w@pre_b + post_b)
#   vaux   [32, 1] : rows 0:H/2 = rc_w2 col, H/2:H/2+H/4 = is_w2 col,
#                    then rc_b2, is_b2 scalars
# ----------------------------------------------------------------------------
def _pack_params(params, hdim):
    h2, h4 = hdim // 2, hdim // 4
    w_comb = params["post_w_t"] @ params["pre_w_t"]                      # [H, H]
    b_comb = params["post_w_t"] @ params["pre_b"] + params["post_b"]     # [H, 1]

    rows = h2 + h4 + hdim
    rows_pad = _round_up(rows, 8)
    wstack = jnp.zeros((rows_pad, hdim), jnp.float32)
    wstack = wstack.at[0:h2].set(params["rc_w1_t"])
    wstack = wstack.at[h2:h2 + h4].set(params["is_w1_t"])
    wstack = wstack.at[h2 + h4:rows].set(w_comb)

    bstack = jnp.zeros((rows_pad, 1), jnp.float32)
    bstack = bstack.at[0:h2].set(params["rc_b1"])
    bstack = bstack.at[h2:h2 + h4].set(params["is_b1"])
    bstack = bstack.at[h2 + h4:rows].set(b_comb)

    vrows_pad = _round_up(h2 + h4 + 2, 8)
    vaux = jnp.zeros((vrows_pad, 1), jnp.float32)
    vaux = vaux.at[0:h2].set(params["rc_w2_c"])
    vaux = vaux.at[h2:h2 + h4].set(params["is_w2_c"])
    vaux = vaux.at[h2 + h4].set(params["rc_b2"][0])
    vaux = vaux.at[h2 + h4 + 1].set(params["is_b2"][0])

    return dict(wstack=wstack, bstack=bstack, vaux=vaux,
                b_comb=b_comb, h2=h2, h4=h4)


# ----------------------------------------------------------------------------
# Fused per-token Pallas kernel.
# Input tile is token-major [T, H]; ONE stacked MXU matmul (transposed-RHS
# contraction) produces all heads; outputs stay lane-dense (tokens on lanes).
# ----------------------------------------------------------------------------
def _make_kernel(h2, h4, hdim):
    z0 = h2 + h4          # 24 for H=32 — 8-row aligned
    z1 = z0 + hdim        # 56

    def kernel(x_ref, ws_ref, bs_ref, va_ref, z_ref, di_ref):
        x = x_ref[...]                                               # [T, H]
        # Single stacked matmul: [rows, H] · [T, H]^T -> [rows, T]
        y = lax.dot_general(ws_ref[...], x,
                            dimension_numbers=(((1,), (1,)), ((), ())),
                            preferred_element_type=jnp.float32)
        y = y + bs_ref[...]                                          # bias col broadcast

        # Block compactor (post∘pre folded affine): lane-dense store
        z_ref[...] = y[z0:z1, :]                                     # [H, T]

        # Region classifier + importance scorer heads
        va = va_ref[...]                                             # [32, 1]
        hg = _gelu_exact(y[0:z0, :]) * va[0:z0, :]                   # [24, T]
        d = jnp.sum(hg[0:h2, :], axis=0, keepdims=True) + va[z0:z0 + 1, :]
        di_ref[0:1, :] = jax.nn.sigmoid(d)                           # density
        di_ref[1:2, :] = (jnp.sum(hg[h2:z0, :], axis=0, keepdims=True)
                          + va[z0 + 1:z0 + 2, :])                    # importance
    return kernel


def _choose_tile(n):
    # Big tiles amortize the ~0.35us per-grid-step overhead; cap so the grid
    # keeps >=2 parallel steps when possible (v7x has 2 TensorCores).
    half = (n + 1) // 2
    return int(max(128, min(4096, _round_up(half, 128))))


def fused_token_stage(tokens, packed):
    """tokens: [N, H] f32 -> (z [H, N], density [N], importance [N])."""
    n, hdim = tokens.shape
    tile = _choose_tile(n)
    n_pad = _round_up(n, tile)
    if n_pad != n:
        tokens = jnp.pad(tokens, ((0, n_pad - n), (0, 0)))

    ws, bs, va = packed["wstack"], packed["bstack"], packed["vaux"]
    kernel = _make_kernel(packed["h2"], packed["h4"], hdim)

    rep = lambda i: (0, 0)          # same block every step -> DMA'd once
    z_t, di = pl.pallas_call(
        kernel,
        grid=(n_pad // tile,),
        out_shape=(
            jax.ShapeDtypeStruct((hdim, n_pad), jnp.float32),
            jax.ShapeDtypeStruct((2, n_pad), jnp.float32),
        ),
        in_specs=[
            pl.BlockSpec((tile, hdim), lambda i: (i, 0)),   # token tile, token-major
            pl.BlockSpec(ws.shape, rep),
            pl.BlockSpec(bs.shape, rep),
            pl.BlockSpec(va.shape, rep),
        ],
        out_specs=[
            pl.BlockSpec((hdim, tile), lambda i: (0, i)),   # lane-dense z
            pl.BlockSpec((2, tile), lambda i: (0, i)),      # lane-dense [density; importance]
        ],
        compiler_params=pltpu.CompilerParams(dimension_semantics=("parallel",)),
    )(tokens, ws, bs, va)

    return z_t[:, :n], di[0, :n], di[1, :n]


# ----------------------------------------------------------------------------
# HybridCompactor forward
# ----------------------------------------------------------------------------
def hybrid_compact(x, params, reduction_ratio=REDUCTION_RATIO, block_size=BLOCK_SIZE):
    b, s, hdim = x.shape
    if s <= block_size * 2:
        return x

    packed = _pack_params(params, hdim)
    tokens = x.reshape(b * s, hdim)                  # no wrapper-side transpose
    z_t, dens, imp = fused_token_stage(tokens, packed)   # one fused Pallas call

    # [H, N] -> [B, S, H] reshuffle done on-device (single XLA transpose).
    z_bsh = z_t.T.reshape(b, s, hdim)
    # Constant row a zero-padded block-compactor position contributes.
    z_pad = packed["b_comb"][:, 0]

    # Single device -> host sync for all data-dependent glue.
    x_np, z_np, dens_np, imp_np, z_pad_np = jax.device_get((x, z_bsh, dens, imp, z_pad))
    x_np = np.asarray(x_np)
    z_np = np.asarray(z_np)
    dens_np = np.asarray(dens_np).reshape(b, s)
    imp_np = np.asarray(imp_np).reshape(b, s)
    z_pad_np = np.asarray(z_pad_np)

    # TODO(synk): data-dependent-shape tail (masking, top-k, ragged concat/pad)
    # stays host-side; all matmuls/GELUs already ran on-device in the fused kernel.
    outs = []
    for bi in range(b):
        mask = dens_np[bi] > SPARSE_THRESHOLD
        high_idx = np.nonzero(mask)[0]
        low_idx = np.nonzero(~mask)[0]
        parts = []
        if high_idx.size > 0:
            keep = max(1, int(high_idx.size * (1.0 - reduction_ratio)))
            order = np.argsort(-imp_np[bi, high_idx], kind="stable")[:keep]
            sel = np.sort(high_idx[order])
            parts.append(x_np[bi, sel])
        if low_idx.size > 0:
            zl = z_np[bi, low_idx]
            rem = zl.shape[0] % block_size
            if rem != 0:
                pad_rows = np.broadcast_to(z_pad_np, (block_size - rem, hdim))
                zl = np.concatenate([zl, pad_rows], axis=0)
            parts.append(zl.reshape(-1, block_size, hdim).mean(axis=1))
        outs.append(np.concatenate(parts, axis=0).astype(np.float32))

    max_len = max(o.shape[0] for o in outs)
    padded = np.zeros((b, max_len, hdim), np.float32)
    for bi, o in enumerate(outs):
        padded[bi, : o.shape[0]] = o
    return jnp.asarray(padded)


# ----------------------------------------------------------------------------
# Pure NumPy reference (mirrors the PyTorch module literally) for a self-check.
# ----------------------------------------------------------------------------
def hybrid_compact_ref(x, params, reduction_ratio=REDUCTION_RATIO, block_size=BLOCK_SIZE):
    p = {k: np.asarray(v, np.float32) for k, v in params.items()}
    x = np.asarray(x, np.float32)
    b, s, hdim = x.shape
    if s <= block_size * 2:
        return x

    def lin(v, w, bcol):                 # torch layout: w [out,in], b [out,1]
        return v @ w.T + bcol[:, 0]

    def region(v):
        h1 = _gelu_np(lin(v, p["rc_w1_t"], p["rc_b1"]))
        out = h1 @ p["rc_w2_c"] + p["rc_b2"][0, 0]
        return 1.0 / (1.0 + np.exp(-out[:, 0]))

    def importance(v):
        h1 = _gelu_np(lin(v, p["is_w1_t"], p["is_b1"]))
        return (h1 @ p["is_w2_c"] + p["is_b2"][0, 0])[:, 0]

    def block(v):
        n = v.shape[0]
        if n % block_size != 0:
            v = np.concatenate([v, np.zeros((block_size - n % block_size, hdim), np.float32)], 0)
        y = lin(v, p["pre_w_t"], p["pre_b"])
        y = y.reshape(-1, block_size, hdim).mean(axis=1)
        return lin(y, p["post_w_t"], p["post_b"])

    def sparse(v):
        n = v.shape[0]
        imp = importance(v)
        keep = max(1, int(n * (1.0 - reduction_ratio)))
        idx = np.sort(np.argsort(-imp, kind="stable")[:keep])
        return v[idx]

    outs = []
    for bi in range(b):
        mask = region(x[bi]) > SPARSE_THRESHOLD
        hi, lo = x[bi][mask], x[bi][~mask]
        if hi.shape[0] == 0:
            comp = block(lo)
        elif lo.shape[0] == 0:
            comp = sparse(hi)
        else:
            comp = np.concatenate([sparse(hi), block(lo)], 0)
        outs.append(comp.astype(np.float32))
    max_len = max(o.shape[0] for o in outs)
    ref = np.zeros((b, max_len, hdim), np.float32)
    for bi, o in enumerate(outs):
        ref[bi, : o.shape[0]] = o
    return ref


# ----------------------------------------------------------------------------
# Deterministic parameter init (torch nn.Linear-style uniform, torch layout)
# ----------------------------------------------------------------------------
def init_params(key, hidden):
    def linear_t(k, fan_in, fan_out):
        k1, k2 = jax.random.split(k)
        bound = 1.0 / np.sqrt(fan_in)
        w = jax.random.uniform(k1, (fan_out, fan_in), jnp.float32, -bound, bound)   # [out, in]
        b = jax.random.uniform(k2, (fan_out, 1), jnp.float32, -bound, bound)        # [out, 1]
        return w, b

    keys = jax.random.split(key, 6)
    pre_w, pre_b = linear_t(keys[0], hidden, hidden)         # block_compactor.pre_pool
    post_w, post_b = linear_t(keys[1], hidden, hidden)       # block_compactor.post_pool
    is_w1, is_b1 = linear_t(keys[2], hidden, hidden // 4)    # sparse importance_scorer[0]
    is_w2, is_b2 = linear_t(keys[3], hidden // 4, 1)         # sparse importance_scorer[2]
    rc_w1, rc_b1 = linear_t(keys[4], hidden, hidden // 2)    # region_classifier[0]
    rc_w2, rc_b2 = linear_t(keys[5], hidden // 2, 1)         # region_classifier[2]
    # Nudge the classifier bias so sigmoid densities straddle the 0.7 threshold
    # and both the sparse and block paths get exercised (deterministic choice).
    rc_b2 = rc_b2 + 0.85
    return dict(
        pre_w_t=pre_w, pre_b=pre_b, post_w_t=post_w, post_b=post_b,
        is_w1_t=is_w1, is_b1=is_b1, is_w2_c=is_w2.T, is_b2=is_b2,
        rc_w1_t=rc_w1, rc_b1=rc_b1, rc_w2_c=rc_w2.T, rc_b2=rc_b2,
    )


if __name__ == "__main__":
    B, S, H = 2, 16, HIDDEN
    x = jax.random.normal(jax.random.PRNGKey(0), (B, S, H), jnp.float32)
    params = init_params(jax.random.PRNGKey(1), H)

    out = hybrid_compact(x, params, reduction_ratio=REDUCTION_RATIO, block_size=BLOCK_SIZE)
    jax.block_until_ready(out)

    ref = hybrid_compact_ref(x, params, REDUCTION_RATIO, BLOCK_SIZE)
    np.testing.assert_allclose(np.asarray(out), ref, rtol=2e-3, atol=2e-3)

    print("KERNEL_OK")
</pallas_src>

<mosaic_0001>
module attributes {stable_mosaic.version = 11 : i64} {
  func.func @kernel(%arg0: i32, %arg1: memref<128x32xf32, #tpu.memory_space<vmem>>, %arg2: memref<56x32xf32, #tpu.memory_space<vmem>>, %arg3: memref<56x1xf32, #tpu.memory_space<vmem>>, %arg4: memref<32x1xf32, #tpu.memory_space<vmem>>, %arg5: memref<32x128xf32, #tpu.memory_space<vmem>>, %arg6: memref<2x128xf32, #tpu.memory_space<vmem>>) attributes {dimension_semantics = [#tpu.dimension_semantics<parallel>], iteration_bounds = array<i64: 1>, scalar_prefetch = 0 : i64, scratch_operands = 0 : i64, tpu.core_type = #tpu.core_type<tc>, window_params = [{transform_indices = @transform_0, window_bounds = array<i64: 128, 32>}, {pipeline_mode = #tpu.pipeline_mode<synchronous>, transform_indices = @transform_1, window_bounds = array<i64: 56, 32>}, {pipeline_mode = #tpu.pipeline_mode<synchronous>, transform_indices = @transform_2, window_bounds = array<i64: 56, 1>}, {pipeline_mode = #tpu.pipeline_mode<synchronous>, transform_indices = @transform_3, window_bounds = array<i64: 32, 1>}, {transform_indices = @transform_4, window_bounds = array<i64: 32, 128>}, {transform_indices = @transform_5, window_bounds = array<i64: 2, 128>}]} {
    %c0 = arith.constant 0 : index
    %c0_0 = arith.constant 0 : index
    %0 = vector.load %arg1[%c0, %c0_0] : memref<128x32xf32, #tpu.memory_space<vmem>>, vector<128x32xf32>
    %c0_1 = arith.constant 0 : index
    %c0_2 = arith.constant 0 : index
    %1 = vector.load %arg2[%c0_1, %c0_2] : memref<56x32xf32, #tpu.memory_space<vmem>>, vector<56x32xf32>
    %cst = arith.constant dense<0.000000e+00> : vector<56x128xf32>
    %2 = tpu.matmul %1, %0, %cst {dimension_numbers = #tpu.dot_dimension_numbers<[1], [1], [0], [0], [0, 0, 1, 0], [], []>} : vector<56x32xf32>, vector<128x32xf32>, vector<56x128xf32> -> vector<56x128xf32>
    %c0_3 = arith.constant 0 : index
    %c0_4 = arith.constant 0 : index
    %3 = vector.load %arg3[%c0_3, %c0_4] : memref<56x1xf32, #tpu.memory_space<vmem>>, vector<56x1xf32>
    %4 = vector.broadcast %3 : vector<56x1xf32> to vector<56x128xf32>
    %5 = arith.addf %2, %4 : vector<56x128xf32>
    %6 = vector.extract_strided_slice %5 {offsets = [24, 0], sizes = [32, 128], strides = [1, 1]} : vector<56x128xf32> to vector<32x128xf32>
    %c0_5 = arith.constant 0 : index
    %c0_6 = arith.constant 0 : index
    %7 = vector.load %arg5[%c0_5, %c0_6] : memref<32x128xf32, #tpu.memory_space<vmem>>, vector<32x128xf32>
    tpu.vector_store %arg5[%c0_5, %c0_6], %6 {strides = array<i32>} : memref<32x128xf32, #tpu.memory_space<vmem>>, vector<32x128xf32>,
    %c0_7 = arith.constant 0 : index
    %c0_8 = arith.constant 0 : index
    %8 = vector.load %arg4[%c0_7, %c0_8] : memref<32x1xf32, #tpu.memory_space<vmem>>, vector<32x1xf32>
    %9 = vector.extract_strided_slice %5 {offsets = [0, 0], sizes = [24, 128], strides = [1, 1]} : vector<56x128xf32> to vector<24x128xf32>
    %cst_9 = arith.constant 0.707106769 : f32
    %10 = vector.broadcast %cst_9 : f32 to vector<24x128xf32>
    %11 = arith.mulf %9, %10 : vector<24x128xf32>
    %12 = math.absf %11 : vector<24x128xf32>
    %cst_10 = arith.constant 0.327591091 : f32
    %13 = vector.broadcast %cst_10 : f32 to vector<24x128xf32>
    %14 = arith.mulf %13, %12 : vector<24x128xf32>
    %cst_11 = arith.constant 1.000000e+00 : f32
    %15 = vector.broadcast %cst_11 : f32 to vector<24x128xf32>
    %16 = arith.addf %15, %14 : vector<24x128xf32>
    %cst_12 = arith.constant 1.000000e+00 : f32
    %17 = vector.broadcast %cst_12 : f32 to vector<24x128xf32>
    %18 = arith.divf %17, %16 : vector<24x128xf32>
    %cst_13 = arith.constant 1.06140542 : f32
    %19 = vector.broadcast %cst_13 : f32 to vector<24x128xf32>
    %20 = arith.mulf %19, %18 : vector<24x128xf32>
    %cst_14 = arith.constant -1.45315206 : f32
    %21 = vector.broadcast %cst_14 : f32 to vector<24x128xf32>
    %22 = arith.addf %20, %21 : vector<24x128xf32>
    %23 = arith.mulf %22, %18 : vector<24x128xf32>
    %cst_15 = arith.constant 1.42141378 : f32
    %24 = vector.broadcast %cst_15 : f32 to vector<24x128xf32>
    %25 = arith.addf %23, %24 : vector<24x128xf32>
    %26 = arith.mulf %25, %18 : vector<24x128xf32>
    %cst_16 = arith.constant -0.284496725 : f32
    %27 = vector.broadcast %cst_16 : f32 to vector<24x128xf32>
    %28 = arith.addf %26, %27 : vector<24x128xf32>
    %29 = arith.mulf %28, %18 : vector<24x128xf32>
    %cst_17 = arith.constant 0.254829586 : f32
    %30 = vector.broadcast %cst_17 : f32 to vector<24x128xf32>
    %31 = arith.addf %29, %30 : vector<24x128xf32>
    %32 = arith.mulf %31, %18 : vector<24x128xf32>
    %cst_18 = arith.constant 0.000000e+00 : f32
    %33 = vector.broadcast %cst_18 : f32 to vector<24x128xf32>
    %34 = arith.subf %33, %12 : vector<24x128xf32>
    %35 = arith.mulf %34, %12 : vector<24x128xf32>
    %36 = math.exp %35 : vector<24x128xf32>
    %37 = arith.mulf %32, %36 : vector<24x128xf32>
    %cst_19 = arith.constant 1.000000e+00 : f32
    %38 = vector.broadcast %cst_19 : f32 to vector<24x128xf32>
    %39 = arith.subf %38, %37 : vector<24x128xf32>
    %cst_20 = arith.constant 0.000000e+00 : f32
    %40 = vector.broadcast %cst_20 : f32 to vector<24x128xf32>
    %41 = arith.cmpf oge, %11, %40 : vector<24x128xf32>
    %cst_21 = arith.constant 0.000000e+00 : f32
    %42 = vector.broadcast %cst_21 : f32 to vector<24x128xf32>
    %43 = arith.subf %42, %39 : vector<24x128xf32>
    %44 = arith.select %41, %39, %43 : vector<24x128xi1>, vector<24x128xf32>
    %cst_22 = arith.constant 5.000000e-01 : f32
    %45 = vector.broadcast %cst_22 : f32 to vector<24x128xf32>
    %46 = arith.mulf %45, %9 : vector<24x128xf32>
    %cst_23 = arith.constant 1.000000e+00 : f32
    %47 = vector.broadcast %cst_23 : f32 to vector<24x128xf32>
    %48 = arith.addf %47, %44 : vector<24x128xf32>
    %49 = arith.mulf %46, %48 : vector<24x128xf32>
    %50 = vector.extract_strided_slice %8 {offsets = [0, 0], sizes = [24, 1], strides = [1, 1]} : vector<32x1xf32> to vector<24x1xf32>
    %51 = vector.broadcast %50 : vector<24x1xf32> to vector<24x128xf32>
    %52 = arith.mulf %49, %51 : vector<24x128xf32>
    %53 = vector.extract_strided_slice %52 {offsets = [0, 0], sizes = [16, 128], strides = [1, 1]} : vector<24x128xf32> to vector<16x128xf32>
    %cst_24 = arith.constant dense<0.000000e+00> : vector<128xf32>
    %54 = vector.multi_reduction <add>, %53, %cst_24 [0] : vector<16x128xf32> to vector<128xf32>
    %55 = vector.shape_cast %54 : vector<128xf32> to vector<1x128xf32>
    %56 = vector.extract_strided_slice %8 {offsets = [24, 0], sizes = [1, 1], strides = [1, 1]} : vector<32x1xf32> to vector<1x1xf32>
    %57 = vector.broadcast %56 : vector<1x1xf32> to vector<1x128xf32>
    %58 = arith.addf %55, %57 : vector<1x128xf32>
    %59 = arith.negf %58 : vector<1x128xf32>
    %60 = math.exp %59 : vector<1x128xf32>
    %cst_25 = arith.constant 1.000000e+00 : f32
    %61 = vector.broadcast %cst_25 : f32 to vector<1x128xf32>
    %62 = arith.addf %61, %60 : vector<1x128xf32>
    %63 = arith.divf %61, %62 : vector<1x128xf32>
    %c0_26 = arith.constant 0 : index
    %c0_27 = arith.constant 0 : index
    %64 = vector.load %arg6[%c0_26, %c0_27] : memref<2x128xf32, #tpu.memory_space<vmem>>, vector<1x128xf32>
    tpu.vector_store %arg6[%c0_26, %c0_27], %63 {strides = array<i32>} : memref<2x128xf32, #tpu.memory_space<vmem>>, vector<1x128xf32>,
    %65 = vector.extract_strided_slice %52 {offsets = [16, 0], sizes = [8, 128], strides = [1, 1]} : vector<24x128xf32> to vector<8x128xf32>
    %cst_28 = arith.constant dense<0.000000e+00> : vector<128xf32>
    %66 = vector.multi_reduction <add>, %65, %cst_28 [0] : vector<8x128xf32> to vector<128xf32>
    %67 = vector.shape_cast %66 : vector<128xf32> to vector<1x128xf32>
    %68 = vector.extract_strided_slice %8 {offsets = [25, 0], sizes = [1, 1], strides = [1, 1]} : vector<32x1xf32> to vector<1x1xf32>
    %69 = vector.broadcast %68 : vector<1x1xf32> to vector<1x128xf32>
    %70 = arith.addf %67, %69 : vector<1x128xf32>
    %c1 = arith.constant 1 : index
    %c0_29 = arith.constant 0 : index
    %71 = vector.load %arg6[%c1, %c0_29] : memref<2x128xf32, #tpu.memory_space<vmem>>, vector<1x128xf32>
    tpu.vector_store %arg6[%c1, %c0_29], %70 {strides = array<i32>} : memref<2x128xf32, #tpu.memory_space<vmem>>, vector<1x128xf32>,
    return
  }
  func.func @transform_0(%arg0: i32) -> (i32, i32) {
    %c0_i32 = arith.constant 0 : i32
    %c0_i32_0 = arith.constant 0 : i32
    return %arg0, %c0_i32 : i32, i32
  }
  func.func @transform_1(%arg0: i32) -> (i32, i32) {
    %c0_i32 = arith.constant 0 : i32
    %c0_i32_0 = arith.constant 0 : i32
    %c0_i32_1 = arith.constant 0 : i32
    return %c0_i32, %c0_i32_0 : i32, i32
  }
  func.func @transform_2(%arg0: i32) -> (i32, i32) {
    %c0_i32 = arith.constant 0 : i32
    %c0_i32_0 = arith.constant 0 : i32
    %c0_i32_1 = arith.constant 0 : i32
    return %c0_i32, %c0_i32_0 : i32, i32
  }
  func.func @transform_3(%arg0: i32) -> (i32, i32) {
    %c0_i32 = arith.constant 0 : i32
    %c0_i32_0 = arith.constant 0 : i32
    %c0_i32_1 = arith.constant 0 : i32
    return %c0_i32, %c0_i32_0 : i32, i32
  }
  func.func @transform_4(%arg0: i32) -> (i32, i32) {
    %c0_i32 = arith.constant 0 : i32
    %c0_i32_0 = arith.constant 0 : i32
    return %c0_i32, %arg0 : i32, i32
  }
  func.func @transform_5(%arg0: i32) -> (i32, i32) {
    %c0_i32 = arith.constant 0 : i32
    %c0_i32_0 = arith.constant 0 : i32
    return %c0_i32, %arg0 : i32, i32
  }
}

</mosaic_0001>

<bundles_post_ra>
// kernel: tpu_custom_call.1
= control target key start
LH: loop header
LB: loop body
LE: loop exit
PB: predicated region body
PF: predicated region fallthrough
CT: control target
= control target key end

     0   :  { %11 = vsyncpa [#allocation3], 0  ;;  %vm86_vm0 = vcmask 261120   ;;  %v622_v1 = vmov 0.0   ;;  %vm623_vm1 = vmmov 0   ;;  %v624_v3 = vmov 0   ;;  %s889_s0 = inlined_call_operand.vmem [shape: f32[128,32], index: 0, kind: input, shape index: {}]   ;;  %s890_s1 = inlined_call_operand.vmem [shape: f32[56,32], index: 1, kind: input, shape index: {}]   ;;  %s891_s2 = inlined_call_operand.vmem [shape: f32[56,1], index: 2, kind: input, shape index: {}]   ;;  %s892_s3 = inlined_call_operand.vmem [shape: f32[32,1], index: 3, kind: input, shape index: {}]   ;;  %s893_s4 = inlined_call_operand.hbm [shape: f32[32,128], index: 4, kind: output, shape index: {0}]   ;;  %s894_s5 = inlined_call_operand.hbm [shape: f32[2,128], index: 5, kind: output, shape index: {1}]  }
   0x1   :  { %v36_v0 = vld [vmem:[%s889_s0 + $0x78] sm:$0xff]  ;;  %468 = vmatprep.subr.mxu0 %v622_v1  ;;  %521 = vmatprep.subr.mxu1 %v622_v1  ;;  %v35_v2 = vld [vmem:[%s889_s0 + $0x70] sm:$0xff]  ;;  %v34_v4 = vld [vmem:[%s889_s0 + $0x68] sm:$0xff] }
   0x2   :  { %469 = vmatpush3.xpose.msk.msra.mxu0 %vm86_vm0, %v36_v0  ;;  %537 = vmatpush3.xpose.msk.msra.mxu1 %vm86_vm0, %v36_v0  ;;  %v44_v5 = vld [vmem:[%s891_s2] sm:$0xff]  ;;  %v45_v6 = vld [vmem:[%s891_s2 + $0x8] sm:$0xff]  ;;  %v46_v7 = vld [vmem:[%s891_s2 + $0x10] sm:$0xff] }
   0x3   :  { %470 = vmatprep.subr.mxu0 %v622_v1  ;;  %522 = vmatprep.subr.mxu1 %v622_v1  ;;  %v33_v8 = vld [vmem:[%s889_s0 + $0x60] sm:$0xff] }
   0x4   :  { %500 = vmatprep.mubr.msk.f32.mxu0 %vm623_vm1, %v622_v1  ;;  %512 = vmatprep.mubr.msk.f32.mxu1 %vm623_vm1, %v622_v1 }
   0x5   :  { %560 = vset.pattern.permute.xlu0 %v624_v3  ;;  %561 = vset.pattern.permute.xlu1 %v624_v3 }
   0x6   :  { %471 = vmatpush3.xpose.msk.msra.mxu0 %vm86_vm0, %v35_v2  ;;  %538 = vmatpush3.xpose.msk.msra.mxu1 %vm86_vm0, %v35_v2 }
   0x7   :  { %472 = vmatprep.subr.mxu0 %v622_v1  ;;  %523 = vmatprep.subr.mxu1 %v622_v1 }
   0x8   :  { %53 = vperm.xlu0 %560, %v44_v5  }
   0xa   :  { %473 = vmatpush3.xpose.msk.msra.mxu0 %vm86_vm0, %v34_v4  ;;  %539 = vmatpush3.xpose.msk.msra.mxu1 %vm86_vm0, %v34_v4 }
   0xb   :  { %474 = vmatprep.subr.mxu0 %v622_v1  ;;  %524 = vmatprep.subr.mxu1 %v622_v1 }
   0xc   :  { %12 = vsyncpa [#allocation5], 0  ;;  %58 = vperm.xlu0 %560, %v45_v6   ;;  %63 = vperm.xlu1 %561, %v46_v7   ;;  %v261_v9 = vld [vmem:[%s892_s3 + $0x8] sm:$0xff]  ;;  %v260_v10 = vld [vmem:[%s892_s3] sm:$0xff] }
   0xd   :  { %v32_v11 = vld [vmem:[%s889_s0 + $0x58] sm:$0xff]  ;;  %v262_v12 = vld [vmem:[%s892_s3 + $0x10] sm:$0xff]  ;;  %v48_v15 = vld [vmem:[%s891_s2 + $0x20] sm:$0xff] }
   0xe   :  { %475 = vmatpush3.xpose.msk.msra.mxu0 %vm86_vm0, %v33_v8  ;;  %540 = vmatpush3.xpose.msk.msra.mxu1 %vm86_vm0, %v33_v8  ;;  %v263_v13 = vld [vmem:[%s892_s3 + $0x18] sm:$0xff]  ;;  %v31_v14 = vld [vmem:[%s889_s0 + $0x50] sm:$0xff]  ;;  %v30_v17 = vld [vmem:[%s889_s0 + $0x48] sm:$0xff] }
   0xf   :  { %476 = vmatprep.subr.mxu0 %v622_v1  ;;  %525 = vmatprep.subr.mxu1 %v622_v1  ;;  %v47_v16 = vld [vmem:[%s891_s2 + $0x18] sm:$0xff]  ;;  %v50_v18 = vld [vmem:[%s891_s2 + $0x30] sm:$0xff]  ;;  %v49_v19 = vld [vmem:[%s891_s2 + $0x28] sm:$0xff] }
  0x10   :  { %352 = vperm.xlu0 %560, %v261_v9   ;;  %347 = vperm.xlu1 %561, %v260_v10   ;;  %v29_v20 = vld [vmem:[%s889_s0 + $0x40] sm:$0xff]  ;;  %v28_v21 = vld [vmem:[%s889_s0 + $0x38] sm:$0xff]  ;;  %v27_v22 = vld [vmem:[%s889_s0 + $0x30] sm:$0xff] }
  0x11   :  { %v26_v23 = vld [vmem:[%s889_s0 + $0x28] sm:$0xff]  ;;  %v25_v24 = vld [vmem:[%s889_s0 + $0x20] sm:$0xff]  ;;  %v24_v25 = vld [vmem:[%s889_s0 + $0x18] sm:$0xff] }
  0x12   :  { %477 = vmatpush3.xpose.msk.msra.mxu0 %vm86_vm0, %v32_v11  ;;  %541 = vmatpush3.xpose.msk.msra.mxu1 %vm86_vm0, %v32_v11  ;;  %v23_v26 = vld [vmem:[%s889_s0 + $0x10] sm:$0xff]  ;;  %v22_v27 = vld [vmem:[%s889_s0 + $0x8] sm:$0xff]  ;;  %v21_v28 = vld [vmem:[%s889_s0] sm:$0xff] }
  0x13   :  { %478 = vmatprep.subr.mxu0 %v622_v1  ;;  %526 = vmatprep.subr.mxu1 %v622_v1  ;;  %v37_v29 = vld [vmem:[%s890_s1] sm:$0xff]  ;;  %v38_v31 = vld [vmem:[%s890_s1 + $0x8] sm:$0xff]  ;;  %v39_v33 = vld [vmem:[%s890_s1 + $0x10] sm:$0xff] }
  0x14   :  { %357 = vperm.xlu0 %560, %v262_v12   ;;  %372 = vperm.xlu1 %561, %v263_v13   ;;  %v41_v30 = vld [vmem:[%s890_s1 + $0x20] sm:$0xff]  ;;  %v42_v32 = vld [vmem:[%s890_s1 + $0x28] sm:$0xff]  ;;  %v43_v34 = vld [vmem:[%s890_s1 + $0x30] sm:$0xff] }
  0x15   :  { %v40_v35 = vld [vmem:[%s890_s1 + $0x18] sm:$0xff]  ;;  %s625_s1 = smov [#allocation2]  }
  0x16   :  { %479 = vmatpush3.xpose.msk.msra.mxu0 %vm86_vm0, %v31_v14  ;;  %542 = vmatpush3.xpose.msk.msra.mxu1 %vm86_vm0, %v31_v14  ;;  %s396_s6 = sshll.u32 %s625_s1, 4  ;;  %s397_s6 = int_to_ptr.vmem [resolvable:$true] %s396_s6 }
  0x17   :  { %480 = vmatprep.subr.mxu0 %v622_v1  ;;  %527 = vmatprep.subr.mxu1 %v622_v1  ;;  %s578_s7 = scalar_lea.vmem %s397_s6, 512  ;;  %p583_p1 = scmp.lt.s32.totalorder %s397_s6, %s397_s6 }
  0x18   :  { %73 = vperm.xlu0 %560, %v48_v15   ;;  %68 = vperm.xlu1 %561, %v47_v16   ;;  %p579_p0 = scmp.ne.s32.totalorder %s397_s6, %s578_s7  ;;  %p584_p2 = scmp.lt.s32.totalorder %s578_s7, %s578_s7 }
  0x1a   :  { %481 = vmatpush3.xpose.msk.msra.mxu0 %vm86_vm0, %v30_v17  ;;  %543 = vmatpush3.xpose.msk.msra.mxu1 %vm86_vm0, %v30_v17  ;;  %p585_p3 = por %p584_p2, %p583_p1 }
  0x1b   :  { %482 = vmatprep.subr.mxu0 %v622_v1  ;;  %528 = vmatprep.subr.mxu1 %v622_v1 }
  0x1c   :  { %83 = vperm.xlu0 %560, %v50_v18   ;;  %78 = vperm.xlu1 %561, %v49_v19   ;;  %p586_p4 = pnand %p585_p3, %p579_p0 }
  0x1e   :  { %483 = vmatpush3.xpose.msk.msra.mxu0 %vm86_vm0, %v29_v20  ;;  %544 = vmatpush3.xpose.msk.msra.mxu1 %vm86_vm0, %v29_v20 }
  0x1f   :  { %484 = vmatprep.subr.mxu0 %v622_v1  ;;  %529 = vmatprep.subr.mxu1 %v622_v1 }
  0x22   :  { %485 = vmatpush3.xpose.msk.msra.mxu0 %vm86_vm0, %v28_v21  ;;  %545 = vmatpush3.xpose.msk.msra.mxu1 %vm86_vm0, %v28_v21 }
  0x23   :  { %486 = vmatprep.subr.mxu0 %v622_v1  ;;  %530 = vmatprep.subr.mxu1 %v622_v1 }
  0x26   :  { %487 = vmatpush3.xpose.msk.msra.mxu0 %vm86_vm0, %v27_v22  ;;  %546 = vmatpush3.xpose.msk.msra.mxu1 %vm86_vm0, %v27_v22 }
  0x27   :  { %488 = vmatprep.subr.mxu0 %v622_v1  ;;  %531 = vmatprep.subr.mxu1 %v622_v1 }
  0x2a   :  { %489 = vmatpush3.xpose.msk.msra.mxu0 %vm86_vm0, %v26_v23  ;;  %547 = vmatpush3.xpose.msk.msra.mxu1 %vm86_vm0, %v26_v23 }
  0x2b   :  { %490 = vmatprep.subr.mxu0 %v622_v1  ;;  %532 = vmatprep.subr.mxu1 %v622_v1 }
  0x2e   :  { %491 = vmatpush3.xpose.msk.msra.mxu0 %vm86_vm0, %v25_v24  ;;  %548 = vmatpush3.xpose.msk.msra.mxu1 %vm86_vm0, %v25_v24 }
  0x2f   :  { %492 = vmatprep.subr.mxu0 %v622_v1  ;;  %533 = vmatprep.subr.mxu1 %v622_v1 }
  0x32   :  { %493 = vmatpush3.xpose.msk.msra.mxu0 %vm86_vm0, %v24_v25  ;;  %549 = vmatpush3.xpose.msk.msra.mxu1 %vm86_vm0, %v24_v25 }
  0x33   :  { %494 = vmatprep.subr.mxu0 %v622_v1  ;;  %534 = vmatprep.subr.mxu1 %v622_v1 }
  0x36   :  { %495 = vmatpush3.xpose.msk.msra.mxu0 %vm86_vm0, %v23_v26  ;;  %550 = vmatpush3.xpose.msk.msra.mxu1 %vm86_vm0, %v23_v26 }
  0x37   :  { %496 = vmatprep.subr.mxu0 %v622_v1  ;;  %535 = vmatprep.subr.mxu1 %v622_v1 }
  0x3a   :  { %497 = vmatpush3.xpose.msk.msra.mxu0 %vm86_vm0, %v22_v27  ;;  %551 = vmatpush3.xpose.msk.msra.mxu1 %vm86_vm0, %v22_v27 }
  0x3b   :  { %498 = vmatprep.subr.mxu0 %v622_v1  ;;  %536 = vmatprep.subr.mxu1 %v622_v1 }
  0x3e   :  { %499 = vmatpush3.xpose.msk.msra.mxu0 %vm86_vm0, %v21_v28  ;;  %552 = vmatpush3.xpose.msk.msra.mxu1 %vm86_vm0, %v21_v28 }
  0x41   :  { %501 = vmatmul.mubr.msk.f32.vlgmr.msra.gmra.mxu0 %vm86_vm0, %v37_v29  ;;  %513 = vmatmul.mubr.msk.f32.vlgmr.msra.gmra.mxu1 %vm86_vm0, %v41_v30 }
  0x42   :  { %503 = vmatprep.mubr.msk.f32.mxu0 %vm623_vm1, %v622_v1  ;;  %515 = vmatprep.mubr.msk.f32.mxu1 %vm623_vm1, %v622_v1 }
  0x45   :  { %504 = vmatmul.mubr.msk.f32.gmra.mxu0 %vm86_vm0, %v38_v31  ;;  %516 = vmatmul.mubr.msk.f32.gmra.mxu1 %vm86_vm0, %v42_v32 }
  0x46   :  { %506 = vmatprep.mubr.msk.f32.mxu0 %vm623_vm1, %v622_v1  ;;  %518 = vmatprep.mubr.msk.f32.mxu1 %vm623_vm1, %v622_v1 }
  0x49   :  { %507 = vmatmul.mubr.msk.f32.gmra.mxu0 %vm86_vm0, %v39_v33  ;;  %519 = vmatmul.mubr.msk.f32.gmra.mxu1 %vm86_vm0, %v43_v34 }
  0x4a   :  { %509 = vmatprep.mubr.msk.f32.mxu0 %vm623_vm1, %v622_v1 }
  0x4d   :  { %510 = vmatmul.mubr.msk.f32.gmra.mxu0 %vm86_vm0, %v40_v35 }
  0x83   :  { %v54_v36 = vpop.permute.xlu0 %53 }
  0x87   :  { %v64_v37 = vpop.permute.xlu1 %63  ;;  %v59_v38 = vpop.permute.xlu0 %58 }
  0x8b   :  { %v846_v39 = vpop.permute.xlu1 %347  ;;  %v848_v40 = vpop.permute.xlu0 %352 }
  0x8f   :  { %v850_v41 = vpop.permute.xlu1 %372  ;;  %v852_v42 = vpop.permute.xlu0 %357 }
  0x93   :  { %v69_v43 = vpop.permute.xlu1 %68  ;;  %v74_v44 = vpop.permute.xlu0 %73 }
  0x97   :  { %v79_v49 = vpop.permute.xlu1 %78  ;;  %v84_v0 = vpop.permute.xlu0 %83 }
 0x101   :  { %v222_v45 = vpop.f32.mrf.mxu0  ;;  %v242_v46 = vpop.f32.mrf.mxu1 }
 0x102   :  { %v854_v47 = vadd.f32 %v222_v45, %v54_v36  ;;  %v243_v48 = vadd.f32 %v242_v46, %v74_v44 }
 0x103   :  { %v502_v50 = vpop.f32.mrf.mxu0  ;;  %v514_v51 = vpop.f32.mrf.mxu1 }
 0x104   :  { %v857_v52 = vmul.f32 0.70710677, %v854_v47  ;;  %257 = vst [vmem:[#allocation2 + $0x8] sm:$0xff] %v243_v48 }
 0x105   :  { %v227_v53 = vpop.f32.mrf.mxu0  ;;  %v247_v54 = vpop.f32.mrf.mxu1 }
 0x106   :  { %v267_v55 = vand.u32 2147483647, %v857_v52  ;;  %v860_v56 = vadd.f32 %v227_v53, %v59_v38  ;;  %v248_v57 = vadd.f32 %v247_v54, %v79_v49 }
 0x107   :  { %v505_v58 = vpop.f32.mrf.mxu0  ;;  %v517_v59 = vpop.f32.mrf.mxu1 }
 0x108   :  { %v270_v60 = vmul.f32 0.3275911, %v267_v55  ;;  %v863_v61 = vmul.f32 0.70710677, %v860_v56  ;;  %258 = vst [vmem:[#allocation2 + $0x10] sm:$0xff] %v248_v57 }
 0x109   :  { %v232_v62 = vpop.f32.mrf.mxu0  ;;  %v252_v63 = vpop.f32.mrf.mxu1 }
 0x10a   :  { %v273_v1 = vadd.f32 1.0, %v270_v60  ;;  %v268_v2 = vand.u32 2147483647, %v863_v61  ;;  %v866_v3 = vadd.f32 %v232_v62, %v64_v37  ;;  %v253_v4 = vadd.f32 %v252_v63, %v84_v0 }
 0x10b   :  { %v508_v5 = vpop.f32.mrf.mxu0  ;;  %v520_v6 = vpop.f32.mrf.mxu1 }
 0x10c   :  { %562 = vrcp.f32 %v273_v1  ;;  %v271_v7 = vmul.f32 0.3275911, %v268_v2  ;;  %v869_v8 = vmul.f32 0.70710677, %v866_v3  ;;  %259 = vst [vmem:[#allocation2 + $0x18] sm:$0xff] %v253_v4 }
 0x10d   :  { %v237_v9 = vpop.f32.mrf.mxu0 }
 0x10e   :  { %v274_v10 = vadd.f32 1.0, %v271_v7  ;;  %v238_v11 = vadd.f32 %v237_v9, %v69_v43  ;;  %v269_v12 = vand.u32 2147483647, %v869_v8 }
 0x10f   :  { %v511_v13 = vpop.f32.mrf.mxu0 }
 0x110   :  { %564 = vrcp.f32 %v274_v10  ;;  %256 = vst [vmem:[#allocation2] sm:$0xff] %v238_v11  ;;  %v272_v14 = vmul.f32 0.3275911, %v269_v12 }
 0x111   :  { %589 = shalt.err (!%p586_p4)
}
 0x112   :  { %s626_s8 = smov 128   ;;  %s627_s9 = smov 8   ;;  %v309_v15 = vsub.f32 0.0, %v267_v55  ;;  %v275_v16 = vadd.f32 1.0, %v272_v14  ;;  %v310_v18 = vsub.f32 0.0, %v268_v2  ;;  %v311_v20 = vsub.f32 0.0, %v269_v12 }
 0x113   :  { %402 = dma.vmem_to_hbm [thread:$0]  %s397_s6, 512, %s893_s4, [#allocation3], %s626_s8, %s626_s8, %s627_s9   ;;  %vm327_vm2 = vcmp.ge.f32.partialorder %v857_v52, 0.0  ;;  %vm328_vm3 = vcmp.ge.f32.partialorder %v863_v61, 0.0  ;;  %vm329_vm4 = vcmp.ge.f32.partialorder %v869_v8, 0.0 }
 0x114   :  { %566 = vrcp.f32 %v275_v16  ;;  %v312_v17 = vmul.f32 %v309_v15, %v267_v55  ;;  %v313_v22 = vmul.f32 %v310_v18, %v268_v2  ;;  %v314_v26 = vmul.f32 %v311_v20, %v269_v12  ;;  %s628_s4 = smov [#allocation4]  }
 0x115   :  { %v336_v12 = vmul.f32 0.5, %v854_v47  ;;  %v337_v15 = vmul.f32 0.5, %v860_v56  ;;  %v338_v47 = vmul.f32 0.5, %v866_v3  ;;  %s409_s12 = sshll.u32 %s628_s4, 4  ;;  %s410_s12 = int_to_ptr.vmem [resolvable:$true] %s409_s12 }
 0x116   :  { %v315_v21 = vmul.f32 1.442695, %v312_v17  ;;  %v317_v28 = vmul.f32 1.442695, %v313_v22  ;;  %v319_v32 = vmul.f32 1.442695, %v314_v26  ;;  %p603_p6 = scmp.lt.s32.totalorder %s410_s12, %s410_s12 }
 0x117   :  { %s598_s13 = scalar_lea.vmem %s410_s12, 32 }
 0x118   :  { %568 = vpow2.f32 %v315_v21  ;;  %p599_p5 = scmp.ne.s32.totalorder %s410_s12, %s598_s13  ;;  %p604_p7 = scmp.lt.s32.totalorder %s598_s13, %s598_s13 }
 0x119   :  { %v563_v19 = vpop.eup %562  ;;  %570 = vpow2.f32 %v317_v28 }
 0x11a   :  { %v282_v23 = vmul.f32 1.0614054, %v563_v19  ;;  %572 = vpow2.f32 %v319_v32  ;;  %p605_p8 = por %p604_p7, %p603_p6 }
 0x11c   :  { %v285_v24 = vadd.f32 -1.4531521, %v282_v23  ;;  %p606_p9 = pnand %p605_p8, %p599_p5 }
 0x11d   :  { %v565_v25 = vpop.eup %564 }
 0x11e   :  { %v283_v27 = vmul.f32 1.0614054, %v565_v25  ;;  %v288_v29 = vmul.f32 %v563_v19, %v285_v24 }
 0x120   :  { %v286_v30 = vadd.f32 -1.4531521, %v283_v27  ;;  %v291_v31 = vadd.f32 1.4214138, %v288_v29 }
 0x121   :  { %v567_v33 = vpop.eup %566 }
 0x122   :  { %v289_v34 = vmul.f32 %v565_v25, %v286_v30  ;;  %v294_v35 = vmul.f32 %v563_v19, %v291_v31  ;;  %v284_v36 = vmul.f32 1.0614054, %v567_v33 }
 0x124   :  { %v292_v37 = vadd.f32 1.4214138, %v289_v34  ;;  %v297_v38 = vadd.f32 -0.28449672, %v294_v35  ;;  %v287_v43 = vadd.f32 -1.4531521, %v284_v36 }
 0x125   :  { %v569_v54 = vpop.eup %568 }
 0x126   :  { %v295_v44 = vmul.f32 %v565_v25, %v292_v37  ;;  %v300_v45 = vmul.f32 %v563_v19, %v297_v38  ;;  %v290_v46 = vmul.f32 %v567_v33, %v287_v43  ;;  %v571_v63 = vpop.eup %570 }
 0x127   :  { %v573_v5 = vpop.eup %572 }
 0x128   :  { %v298_v48 = vadd.f32 -0.28449672, %v295_v44  ;;  %v303_v49 = vadd.f32 0.2548296, %v300_v45  ;;  %v293_v50 = vadd.f32 1.4214138, %v290_v46 }
 0x12a   :  { %v301_v51 = vmul.f32 %v565_v25, %v298_v48  ;;  %v306_v53 = vmul.f32 %v563_v19, %v303_v49  ;;  %v296_v55 = vmul.f32 %v567_v33, %v293_v50 }
 0x12c   :  { %v304_v57 = vadd.f32 0.2548296, %v301_v51  ;;  %v321_v58 = vmul.f32 %v569_v54, %v306_v53  ;;  %v299_v59 = vadd.f32 -0.28449672, %v296_v55 }
 0x12e   :  { %v307_v60 = vmul.f32 %v565_v25, %v304_v57  ;;  %v324_v62 = vsub.f32 1.0, %v321_v58  ;;  %v302_v0 = vmul.f32 %v567_v33, %v299_v59 }
 0x130   :  { %v322_v1 = vmul.f32 %v571_v63, %v307_v60  ;;  %v330_v2 = vsub.f32 0.0, %v324_v62  ;;  %v305_v4 = vadd.f32 0.2548296, %v302_v0 }
 0x132   :  { %v325_v6 = vsub.f32 1.0, %v322_v1  ;;  %v333_v7 = vsel %vm327_vm2, %v324_v62, %v330_v2  ;;  %v308_v9 = vmul.f32 %v567_v33, %v305_v4 }
 0x133   :  { %v339_v10 = vadd.f32 1.0, %v333_v7 }
 0x134   :  { %v331_v11 = vsub.f32 0.0, %v325_v6  ;;  %v323_v13 = vmul.f32 %v573_v5, %v308_v9 }
 0x135   :  { %v342_v18 = vmul.f32 %v339_v10, %v336_v12 }
 0x136   :  { %v334_v14 = vsel %vm328_vm3, %v325_v6, %v331_v11  ;;  %v326_v17 = vsub.f32 1.0, %v323_v13 }
 0x137   :  { %v340_v16 = vadd.f32 1.0, %v334_v14  ;;  %v360_v21 = vmul.f32 %v846_v39, %v342_v18 }
 0x138   :  { %v332_v52 = vsub.f32 0.0, %v326_v17 }
 0x139   :  { %v343_v19 = vmul.f32 %v340_v16, %v337_v15 }
 0x13a   :  { %v335_v20 = vsel %vm329_vm4, %v326_v17, %v332_v52 }
 0x13b   :  { %v361_v22 = vmul.f32 %v848_v40, %v343_v19  ;;  %v341_v23 = vadd.f32 1.0, %v335_v20 }
 0x13d   :  { %v363_v61 = vadd.f32 %v361_v22, %v360_v21  ;;  %v344_v24 = vmul.f32 %v341_v23, %v338_v47 }
 0x13f   :  { %v364_v25 = vrot.slane %v363_v61, 4  ;;  %v362_v56 = vmul.f32 %v852_v42, %v344_v24 }
 0x141   :  { %v365_v26 = vadd.f32 %v364_v25, %v363_v61  ;;  %v383_v27 = vrot.slane %v362_v56, 4 }
 0x143   :  { %v366_v28 = vrot.slane %v365_v26, 2  ;;  %v384_v29 = vadd.f32 %v383_v27, %v362_v56 }
 0x145   :  { %v367_v30 = vadd.f32 %v366_v28, %v365_v26  ;;  %v385_v31 = vrot.slane %v384_v29, 2 }
 0x147   :  { %v368_v8 = vrot.slane %v367_v30, 1  ;;  %v386_v32 = vadd.f32 %v385_v31, %v384_v29 }
 0x149   :  { %v369_v33 = vadd.f32 %v368_v8, %v367_v30  ;;  %v387_v39 = vrot.slane %v386_v32, 1 }
 0x14b   :  { %v375_v40 = vadd.f32 %v850_v41, %v369_v33  ;;  %v388_v34 = vadd.f32 %v387_v39, %v386_v32 }
 0x14d   :  { %v444_v3 = vmul.f32 -1.442695, %v375_v40  ;;  %v389_v35 = vadd.f32 %v388_v34, %v850_v41 }
 0x14f   :  { %574 = vpow2.f32 %v444_v3  ;;  %390 = vst [vmem:[#allocation4] sm:$0x2] %v389_v35 }
 0x15c   :  { %v575_v36 = vpop.eup %574 }
 0x15d   :  { %v379_v42 = vadd.f32 1.0, %v575_v36 }
 0x15f   :  { %576 = vrcp.f32 %v379_v42 }
 0x16c   :  { %v577_v37 = vpop.eup %576 }
 0x16d   :  { %382 = vst [vmem:[#allocation4] sm:$0x1] %v577_v37 }
 0x16e   :  { %609 = shalt.err (!%p606_p9)
}
 0x16f   :  { %412 = dma.vmem_to_hbm [thread:$0]  %s410_s12, 32, %s894_s5, [#allocation5]  }
 0x170   :  { %618 = dma.done.wait [#allocation3], 512  }
 0x171   :  { %619 = vsyncadd [#allocation3], 4294966784 }
 0x172   :  { %620 = dma.done.wait [#allocation5], 32  }
 0x173   :  { %621 = vsyncadd [#allocation5], 4294967264 }
 0x174   :  { %419 = vsyncpa [#allocation3], 1 }
 0x175   :  { %420 = vsyncpa [#allocation5], 1 }

</bundles_post_ra>
